<compile_context>
chip_gen: v7x
topology: tpu7x:2x2x1
jax: 0.10.0
libtpu: 0.0.40
codegen_flags: <defaults>
</compile_context>

<pallas_src>
import functools

import jax
import jax.numpy as jnp
from jax import lax
from jax.experimental import pallas as pl
from jax.experimental.pallas import tpu as pltpu


_MIB = 1024 * 1024


@functools.lru_cache(maxsize=1)
def _vmem_capacity_bytes() -> int:
    """Physical VMEM of the attached TPU; conservative fallback (v7x = 64 MiB)."""
    try:
        return int(pltpu.get_tpu_info().vmem_capacity_bytes)
    except Exception:
        return 64 * _MIB


@functools.lru_cache(maxsize=1)
def _budget():
    """(target raw block bytes, vmem_limit_bytes) per TPU generation."""
    cap = _vmem_capacity_bytes()
    if cap <= 64 * _MIB:
        # v7x: 64 MiB VMEM but ~3.2 TB/s HBM -> bigger blocks hide the ~0.35 us
        # per-grid-step overhead; 2 in + 2 out x 8 MiB = 32 MiB stays under 48.
        return 8 * _MIB, 48 * _MIB
    # v5e / v6e: 128 MiB VMEM, ~0.8-1.4 TB/s HBM -> 4 MiB blocks are ~90% of
    # the HBM roofline already.
    return 4 * _MIB, 64 * _MIB


def _choose_layout(D: int, itemsize: int):
    """Pick (L, R, tile_rows, D_pad) for the (K, R, L) view of the gradients."""
    target_block_bytes, _ = _budget()
    # Lane width: largest of 512/256/128 dividing D -> zero-copy reshape.
    L = None
    for cand in (512, 256, 128):
        if D % cand == 0 and D > 0:
            L = cand
            break
    if L is None:
        # Cold path: D not a multiple of 128 -> zero-pad up to one (costs one
        # extra copy of the gradients; norms/scaled values are unaffected).
        L = 128
        D_pad = ((D + 127) // 128) * 128
    else:
        D_pad = D
    R = D_pad // L
    # Sublane packing of the input dtype: f32 -> 8, bf16 -> 16, int8/fp8 -> 32,
    # so the block's second-to-last dim never forces VMEM padding.
    pack = max(8, 32 // max(1, itemsize))
    target_rows = max(pack, target_block_bytes // (L * itemsize))
    if R <= target_rows:
        tile_rows = R                      # single row block (== full dim: legal)
    else:
        tile_rows = (target_rows // pack) * pack
    return L, R, tile_rows, D_pad


# ---------------------------------------------------------------------------
# Kernel 1: per-task squared-L2 partial sums.
#   grid = (K, row_tiles); K "parallel" (megacore on v7x), row_tiles "arbitrary".
#   Accumulator is (1, L) f32 in VMEM: per step only a sublane-axis reduction
#   (VPU adds); the final cross-lane reduce to a scalar happens in JAX glue.
# ---------------------------------------------------------------------------
def _make_sq_norm_kernel(R: int, tile_rows: int, L: int):
    ragged = (R % tile_rows) != 0

    def kernel(g_ref, out_ref, acc_ref):
        r = pl.program_id(1)
        last = pl.num_programs(1) - 1

        @pl.when(r == 0)
        def _():
            acc_ref[...] = jnp.zeros_like(acc_ref)

        def accumulate(masked):
            g = g_ref[...].astype(jnp.float32)           # (1, tile_rows, L)
            gsq = g * g
            if masked:
                row = r * tile_rows + lax.broadcasted_iota(
                    jnp.int32, (1, tile_rows, L), 1)
                gsq = jnp.where(row < R, gsq, 0.0)
            acc_ref[...] += jnp.sum(gsq, axis=1)         # (1, L): sublane reduce only

        if ragged:
            # Mask only the last (partial) row block; the hot path stays unmasked.
            @pl.when(r < last)
            def _():
                accumulate(False)

            @pl.when(r == last)
            def _():
                accumulate(True)
        else:
            accumulate(False)

        @pl.when(r == last)
        def _():
            out_ref[...] = acc_ref[...][None]            # (1, 1, L) per-lane partials

    return kernel


def _sq_norm_partials(g3d, tile_rows, vmem_limit):
    K, R, L = g3d.shape
    grid = (K, pl.cdiv(R, tile_rows))
    return pl.pallas_call(
        _make_sq_norm_kernel(R, tile_rows, L),
        out_shape=jax.ShapeDtypeStruct((K, 1, L), jnp.float32),
        grid_spec=pltpu.PrefetchScalarGridSpec(
            num_scalar_prefetch=0,
            grid=grid,
            in_specs=[pl.BlockSpec((1, tile_rows, L), lambda k, r: (k, r, 0))],
            out_specs=pl.BlockSpec((1, 1, L), lambda k, r: (k, 0, 0)),
            scratch_shapes=[pltpu.VMEM((1, L), jnp.float32)],
        ),
        compiler_params=pltpu.CompilerParams(
            dimension_semantics=("parallel", "arbitrary"),
            vmem_limit_bytes=vmem_limit),
    )(g3d)


# ---------------------------------------------------------------------------
# Kernel 2: elementwise per-task rescale.  The per-task scale lives in SMEM as
# a (K,) f32 array; the kernel body is a scalar * vreg multiply + cast.
# ---------------------------------------------------------------------------
def _scale_kernel(scale_ref, g_ref, o_ref):
    s = scale_ref[pl.program_id(0)]                       # f32 scalar from SMEM
    o_ref[...] = (g_ref[...].astype(jnp.float32) * s).astype(o_ref.dtype)


def _scale(scale_k, g3d, tile_rows, vmem_limit):
    K, R, L = g3d.shape
    grid = (K, pl.cdiv(R, tile_rows))
    return pl.pallas_call(
        _scale_kernel,
        out_shape=jax.ShapeDtypeStruct((K, R, L), g3d.dtype),
        grid_spec=pltpu.PrefetchScalarGridSpec(
            num_scalar_prefetch=0,
            grid=grid,
            in_specs=[
                pl.BlockSpec(memory_space=pltpu.MemorySpace.SMEM),   # (K,) scales
                pl.BlockSpec((1, tile_rows, L), lambda k, r: (k, r, 0)),
            ],
            out_specs=pl.BlockSpec((1, tile_rows, L), lambda k, r: (k, r, 0)),
        ),
        compiler_params=pltpu.CompilerParams(
            dimension_semantics=("parallel", "parallel"),
            vmem_limit_bytes=vmem_limit),
    )(scale_k, g3d)


# ---------------------------------------------------------------------------
# Single jitted device function: norm pass -> K-sized scalar glue -> scale pass.
# ---------------------------------------------------------------------------
@jax.jit
def _nsgd_device(grads, initial_grads, update):
    K = grads.shape[0]
    orig_shape = grads.shape
    g2d = grads.reshape(K, -1)                            # metadata-only collapse
    D = g2d.shape[1]
    itemsize = jnp.dtype(g2d.dtype).itemsize
    L, R, tile_rows, D_pad = _choose_layout(D, itemsize)
    _, vmem_limit = _budget()

    if D_pad != D:
        g2d_k = jnp.pad(g2d, ((0, 0), (0, D_pad - D)))    # cold path (D % 128 != 0)
    else:
        g2d_k = g2d
    g3d = g2d_k.reshape(K, R, L)                          # metadata-only when no pad

    # --- hot pass 1: per-task squared-norm partials (Pallas) ---
    partials = _sq_norm_partials(g3d, tile_rows, vmem_limit)     # (K, 1, L) f32
    grad_norms = jnp.sqrt(jnp.sum(partials, axis=(1, 2)))        # (K,)

    # PyTorch buffer semantics: on the update step initial_grads is overwritten
    # with grad_norms BEFORE conv_ratios is computed (so conv_ratios == 1 then).
    init = jnp.where(update, grad_norms, initial_grads.astype(jnp.float32))
    conv_ratios = grad_norms / jnp.maximum(init, 1e-15)
    alphas = conv_ratios / jnp.maximum(jnp.sum(conv_ratios), 1e-15)
    alphas = alphas / jnp.sum(alphas)
    weighted_sum_norms = jnp.sum(alphas * grad_norms)
    scale = (weighted_sum_norms /
             jnp.maximum(grad_norms, 1e-15)).astype(jnp.float32)  # (K,)

    # --- hot pass 2: per-task rescale (Pallas) ---
    out3d = _scale(scale, g3d, tile_rows, vmem_limit)             # (K, R, L)
    out2d = out3d.reshape(K, D_pad)
    if D_pad != D:
        out2d = out2d[:, :D]
    return out2d.reshape(orig_shape), grad_norms


# ---------------------------------------------------------------------------
# NSGD module (host-side state mirrors the PyTorch buffer / counter logic)
# ---------------------------------------------------------------------------
class NSGD:
    """Normalized Stochastic Gradient Descent MOO method (Pallas TPU backend)."""
    requires_input: bool = False

    def __init__(self, num_tasks: int, update_at: int = 20):
        self.num_tasks = num_tasks
        self.update_at = update_at
        # register_buffer('initial_grads', torch.ones(num_tasks))
        self.initial_grads = jnp.ones((num_tasks,), jnp.float32)
        self.counter = 0

    def __call__(self, grads, inputs=None, outputs=None):
        update = (self.initial_grads is None) or (self.counter == self.update_at)
        init = (self.initial_grads if self.initial_grads is not None
                else jnp.ones((grads.shape[0],), jnp.float32))
        new_grads, grad_norms = _nsgd_device(grads, init, update)
        if update:
            self.initial_grads = grad_norms
        self.counter += 1
        return new_grads

    forward = __call__


# ---------------------------------------------------------------------------
# Pure-JAX reference (for correctness check)
# ---------------------------------------------------------------------------
def _nsgd_ref(grads, initial_grads):
    K = grads.shape[0]
    g2d = grads.reshape(K, -1).astype(jnp.float32)
    grad_norms = jnp.linalg.norm(g2d, axis=1)
    conv_ratios = grad_norms / jnp.maximum(initial_grads, 1e-15)
    alphas = conv_ratios / jnp.maximum(conv_ratios.sum(), 1e-15)
    alphas = alphas / alphas.sum()
    wsn = jnp.sum(alphas * grad_norms)
    scale = wsn / jnp.maximum(grad_norms, 1e-15)
    return (g2d * scale[:, None]).reshape(grads.shape).astype(grads.dtype)


if __name__ == "__main__":
    key = jax.random.PRNGKey(0)
    k1, k2, k3 = jax.random.split(key, 3)

    # Case 1: f32, K=4 tasks, per-task gradient of 8*128 = 1024 elements.
    grads1 = jax.random.normal(k1, (4, 8, 128), dtype=jnp.float32)
    nsgd1 = NSGD(num_tasks=4, update_at=20)
    out1 = jax.block_until_ready(nsgd1(grads1, None, None))
    ref1 = _nsgd_ref(grads1, jnp.ones((4,), jnp.float32))
    assert out1.shape == grads1.shape and out1.dtype == grads1.dtype
    assert jnp.allclose(out1, ref1, atol=1e-5, rtol=1e-5)

    # Case 2: D not a multiple of 128 -> exercises the zero-pad cold path.
    grads2 = jax.random.normal(k2, (3, 5, 7), dtype=jnp.float32)     # D = 35
    nsgd2 = NSGD(num_tasks=3, update_at=20)
    out2 = jax.block_until_ready(nsgd2(grads2, None, None))
    ref2 = _nsgd_ref(grads2, jnp.ones((3,), jnp.float32))
    assert out2.shape == grads2.shape
    assert jnp.allclose(out2, ref2, atol=1e-5, rtol=1e-5)

    # Case 3: bf16 gradients (dense sublane packing path).
    grads3 = jax.random.normal(k3, (4, 16, 64), dtype=jnp.bfloat16)  # D = 1024
    nsgd3 = NSGD(num_tasks=4, update_at=20)
    out3 = jax.block_until_ready(nsgd3(grads3, None, None))
    ref3 = _nsgd_ref(grads3, jnp.ones((4,), jnp.float32))
    assert out3.dtype == grads3.dtype
    assert jnp.allclose(out3.astype(jnp.float32), ref3.astype(jnp.float32),
                        atol=3e-2, rtol=3e-2)

    print("KERNEL_OK")
</pallas_src>

<mosaic_0001>
module attributes {stable_mosaic.version = 11 : i64} {
  func.func @kernel(%arg0: i32, %arg1: i32, %arg2: memref<1x2x512xf32, #tpu.memory_space<vmem>>, %arg3: memref<1x1x512xf32, #tpu.memory_space<vmem>>, %arg4: memref<1x512xf32, #tpu.memory_space<vmem>>) attributes {dimension_semantics = [#tpu.dimension_semantics<parallel>, #tpu.dimension_semantics<arbitrary>], iteration_bounds = array<i64: 4, 1>, scalar_prefetch = 0 : i64, scratch_operands = 1 : i64, tpu.core_type = #tpu.core_type<tc>, window_params = [{transform_indices = @transform_0, window_bounds = array<i64: 1, 2, 512>}, {transform_indices = @transform_1, window_bounds = array<i64: 1, 1, 512>}]} {
    %c0_i32 = arith.constant 0 : i32
    %0 = arith.cmpi eq, %arg1, %c0_i32 : i32
    %1 = arith.extui %0 : i1 to i32
    %c0_i32_0 = arith.constant 0 : i32
    %2 = arith.cmpi ne, %1, %c0_i32_0 : i32
    scf.if %2 {
      %cst_9 = arith.constant 0.000000e+00 : f32
      %12 = vector.broadcast %cst_9 : f32 to vector<1x512xf32>
      %c0_10 = arith.constant 0 : index
      %c0_11 = arith.constant 0 : index
      %13 = vector.load %arg4[%c0_10, %c0_11] : memref<1x512xf32, #tpu.memory_space<vmem>>, vector<1x512xf32>
      tpu.vector_store %arg4[%c0_10, %c0_11], %12 {strides = array<i32>} : memref<1x512xf32, #tpu.memory_space<vmem>>, vector<1x512xf32>,
    } else {
    }
    %c0 = arith.constant 0 : index
    %c0_1 = arith.constant 0 : index
    %c0_2 = arith.constant 0 : index
    %3 = vector.load %arg2[%c0, %c0_1, %c0_2] : memref<1x2x512xf32, #tpu.memory_space<vmem>>, vector<1x2x512xf32>
    %4 = arith.mulf %3, %3 : vector<1x2x512xf32>
    %c0_3 = arith.constant 0 : index
    %c0_4 = arith.constant 0 : index
    %5 = vector.load %arg4[%c0_3, %c0_4] : memref<1x512xf32, #tpu.memory_space<vmem>>, vector<1x512xf32>
    %cst = arith.constant dense<0.000000e+00> : vector<1x512xf32>
    %6 = vector.multi_reduction <add>, %4, %cst [1] : vector<1x2x512xf32> to vector<1x512xf32>
    %7 = arith.addf %5, %6 : vector<1x512xf32>
    %c0_5 = arith.constant 0 : index
    %c0_6 = arith.constant 0 : index
    %8 = vector.load %arg4[%c0_5, %c0_6] : memref<1x512xf32, #tpu.memory_space<vmem>>, vector<1x512xf32>
    tpu.vector_store %arg4[%c0_5, %c0_6], %7 {strides = array<i32>} : memref<1x512xf32, #tpu.memory_space<vmem>>, vector<1x512xf32>,
    %c0_i32_7 = arith.constant 0 : i32
    %9 = arith.cmpi eq, %arg1, %c0_i32_7 : i32
    %10 = arith.extui %9 : i1 to i32
    %c0_i32_8 = arith.constant 0 : i32
    %11 = arith.cmpi ne, %10, %c0_i32_8 : i32
    scf.if %11 {
      %c0_9 = arith.constant 0 : index
      %c0_10 = arith.constant 0 : index
      %12 = vector.load %arg4[%c0_9, %c0_10] : memref<1x512xf32, #tpu.memory_space<vmem>>, vector<1x512xf32>
      %13 = vector.shape_cast %12 : vector<1x512xf32> to vector<1x1x512xf32>
      %c0_11 = arith.constant 0 : index
      %c0_12 = arith.constant 0 : index
      %c0_13 = arith.constant 0 : index
      %14 = vector.load %arg3[%c0_11, %c0_12, %c0_13] : memref<1x1x512xf32, #tpu.memory_space<vmem>>, vector<1x1x512xf32>
      tpu.vector_store %arg3[%c0_11, %c0_12, %c0_13], %13 {strides = array<i32>} : memref<1x1x512xf32, #tpu.memory_space<vmem>>, vector<1x1x512xf32>,
    } else {
    }
    return
  }
  func.func @transform_0(%arg0: i32, %arg1: i32) -> (i32, i32, i32) {
    %c0_i32 = arith.constant 0 : i32
    %c0_i32_0 = arith.constant 0 : i32
    return %arg0, %arg1, %c0_i32 : i32, i32, i32
  }
  func.func @transform_1(%arg0: i32, %arg1: i32) -> (i32, i32, i32) {
    %c0_i32 = arith.constant 0 : i32
    %c0_i32_0 = arith.constant 0 : i32
    %c0_i32_1 = arith.constant 0 : i32
    return %arg0, %c0_i32, %c0_i32_0 : i32, i32, i32
  }
}

module attributes {stable_mosaic.version = 11 : i64} {
  func.func @_scale_kernel(%arg0: i32, %arg1: i32, %arg2: memref<4xf32, #tpu.memory_space<smem>>, %arg3: memref<1x2x512xf32, #tpu.memory_space<vmem>>, %arg4: memref<1x2x512xf32, #tpu.memory_space<vmem>>) attributes {dimension_semantics = [#tpu.dimension_semantics<parallel>, #tpu.dimension_semantics<parallel>], iteration_bounds = array<i64: 4, 1>, scalar_prefetch = 0 : i64, scratch_operands = 0 : i64, tpu.core_type = #tpu.core_type<tc>, window_params = [{transform_indices = @transform_0, window_bounds = array<i64: 4>}, {transform_indices = @transform_1, window_bounds = array<i64: 1, 2, 512>}, {transform_indices = @transform_2, window_bounds = array<i64: 1, 2, 512>}]} {
    %0 = arith.index_cast %arg0 : i32 to index
    %1 = memref.load %arg2[%0] : memref<4xf32, #tpu.memory_space<smem>>
    %c0 = arith.constant 0 : index
    %c0_0 = arith.constant 0 : index
    %c0_1 = arith.constant 0 : index
    %2 = vector.load %arg3[%c0, %c0_0, %c0_1] : memref<1x2x512xf32, #tpu.memory_space<vmem>>, vector<1x2x512xf32>
    %3 = vector.broadcast %1 : f32 to vector<1x2x512xf32>
    %4 = arith.mulf %2, %3 : vector<1x2x512xf32>
    %c0_2 = arith.constant 0 : index
    %c0_3 = arith.constant 0 : index
    %c0_4 = arith.constant 0 : index
    %5 = vector.load %arg4[%c0_2, %c0_3, %c0_4] : memref<1x2x512xf32, #tpu.memory_space<vmem>>, vector<1x2x512xf32>
    tpu.vector_store %arg4[%c0_2, %c0_3, %c0_4], %4 {strides = array<i32>} : memref<1x2x512xf32, #tpu.memory_space<vmem>>, vector<1x2x512xf32>,
    return
  }
  func.func @transform_0(%arg0: i32, %arg1: i32) -> i32 {
    %c0_i32 = arith.constant 0 : i32
    %c0_i32_0 = arith.constant 0 : i32
    return %c0_i32 : i32
  }
  func.func @transform_1(%arg0: i32, %arg1: i32) -> (i32, i32, i32) {
    %c0_i32 = arith.constant 0 : i32
    %c0_i32_0 = arith.constant 0 : i32
    return %arg0, %arg1, %c0_i32 : i32, i32, i32
  }
  func.func @transform_2(%arg0: i32, %arg1: i32) -> (i32, i32, i32) {
    %c0_i32 = arith.constant 0 : i32
    %c0_i32_0 = arith.constant 0 : i32
    return %arg0, %arg1, %c0_i32 : i32, i32, i32
  }
}

</mosaic_0001>

<bundles_post_ra>
// kernel: _nsgd_device.2
= control target key start
LH: loop header
LB: loop body
LE: loop exit
PB: predicated region body
PF: predicated region fallthrough
CT: control target
= control target key end

     0   :  { %s389_s6 = smov 0   ;;  %s391_s7 = smov 0   ;;  %s436_s0 = inlined_call_operand.vmem [shape: f32[4,2,512], index: 0, kind: input, shape index: {}]   ;;  %s437_s1 = inlined_call_operand.vmem [shape: f32[4,1,512], index: 1, kind: output, shape index: {}]  }
   0x1   :  { %s393_s8 = smov 0  }
   0x2 LB: > { %s23_s9 = sadd.s32 1, %s370_s7  ;;  %p318_p0 = scmp.ge.s32.totalorder %s374_s8, 1  ;;  %s374_s8 = sphi %s393_s8, %s11_s8   ;;  %s370_s7 = sphi %s391_s7, %s441_s7   ;;  %s366_s6 = sphi %s389_s6, %s440_s6  }
   0x3   : > { %p25_p1 = scmp.ge.s32.totalorder %s23_s9, 4  ;;  %p105_p2 = scmp.lt.s32.totalorder %s374_s8, 5 }
   0x5   : > { %s443_s9 = smov (%p25_p1, %s23_s9), 0  ;;  %p106_p3 = pnand %p318_p0, %p105_p2 }
   0x6   : > { %p128_p4 = scmp.lt.s32.totalorder (!%p106_p3), %s366_s6, 3  ;;  %v145_v0 = vlaneseq (!%p106_p3)  ;;  %v376_v1 = vmov (!%p106_p3), 1983009808   ;;  %v377_v5 = vmov (!%p106_p3), 0.0   ;;  %vm175_vm1 = vcmask (!%p106_p3), 1041408  }
   0x7   : > { %109 = sbr.rel (%p106_p3) target bundleno = 58 (0x3a), region = 24  ;;  %v156_v2 = vunpack.c.l.s4 (!%p106_p3), %v376_v1  ;;  %v378_v23 = vmov (!%p106_p3), 1966171168  }
   0x8   : > { %vm409_vm0 = vcmp.lt.s32.totalorder (!%p106_p3), %v145_v0, 512  ;;  %v159_v4 = vshrl.u32 (!%p106_p3), %v145_v0, 7  ;;  %v211_v24 = vunpack.c.l.s4 (!%p106_p3), %v378_v23 }
   0x9   : > { %149 = vst.msk [vmem:[#allocation2] sm:$0xf] (!%p106_p3), %vm409_vm0, %v377_v5  ;;  %v157_v6 = vunpack.c.0.s8 (!%p106_p3), %v156_v2 }
   0xa   : > { %v212_v33 = vunpack.c.0.s8 (!%p106_p3), %v211_v24 }
   0xb   : > { %v160_v7 = vsub.s32 (!%p106_p3), %v157_v6, %v159_v4 }
   0xc   : > { %v215_v42 = vsub.s32 (!%p106_p3), %v212_v33, %v159_v4 }
   0xe   : > { %s445_s6 = smov (!%p128_p4, %s366_s6), 3 }
   0xf   : > { %s324_s10 = sshll.u32 %s445_s6, 3  ;;  %s321_s14 = sshll.u32 %s445_s6, 2 }
  0x10   : > { %s136_s13 = scalar_lea.vmem %s436_s0, %s324_s10  ;;  %v152_v52 = vld [vmem:[#allocation2] sm:$0xf]  ;;  %s140_s17 = scalar_lea.vmem %s437_s1, %s321_s14 }
  0x11   : > { %v150_v8 = vld [vmem:[%s136_s13] sm:$0xff] }
  0x12   : > { %v151_v9 = vmul.f32 %v150_v8, %v150_v8 }
  0x14   : > { %v154_v10 = vcombine.high %v151_v9, %v151_v9  ;;  %v161_v11 = vrot.slane %v151_v9, %v160_v7 }
  0x16   : > { %v168_v12 = vrot.slane %v154_v10, %v160_v7  ;;  %v169_v13 = vcombine.high %v161_v11, %v161_v11  ;;  %v176_v14 = vsel %vm175_vm1, %v161_v11, 0.0 }
  0x17   : > { %v177_v15 = vrot.slane %v176_v14, 4 }
  0x18   : > { %v170_v16 = vcombine.high %v168_v12, %v168_v12  ;;  %v183_v17 = vsel %vm175_vm1, %v169_v13, 0.0  ;;  %v190_v18 = vsel %vm175_vm1, %v168_v12, 0.0 }
  0x19   : > { %v178_v19 = vadd.f32 %v177_v15, %v176_v14  ;;  %v184_v20 = vrot.slane %v183_v17, 4  ;;  %v191_v21 = vrot.slane %v190_v18, 4 }
  0x1a   : > { %v197_v22 = vsel %vm175_vm1, %v170_v16, 0.0 }
  0x1b   : > { %v179_v25 = vrot.slane %v178_v19, 2  ;;  %v185_v26 = vadd.f32 %v184_v20, %v183_v17  ;;  %v192_v27 = vadd.f32 %v191_v21, %v190_v18  ;;  %v198_v28 = vrot.slane %v197_v22, 4 }
  0x1d   : > { %v180_v29 = vadd.f32 %v179_v25, %v178_v19  ;;  %v186_v30 = vrot.slane %v185_v26, 2  ;;  %v193_v31 = vrot.slane %v192_v27, 2  ;;  %v199_v32 = vadd.f32 %v198_v28, %v197_v22 }
  0x1f   : > { %v194_v34 = vadd.f32 %v193_v31, %v192_v27  ;;  %v200_v35 = vrot.slane %v199_v32, 2  ;;  %v181_v36 = vrot.slane %v180_v29, 1  ;;  %v187_v37 = vadd.f32 %v186_v30, %v185_v26 }
  0x21   : > { %v182_v38 = vadd.f32 %v181_v36, %v180_v29  ;;  %v188_v39 = vrot.slane %v187_v37, 1  ;;  %v195_v40 = vrot.slane %v194_v34, 1  ;;  %v201_v41 = vadd.f32 %v200_v35, %v199_v32 }
  0x23   : > { %v189_v43 = vadd.f32 %v188_v39, %v187_v37  ;;  %v196_v44 = vadd.f32 %v195_v40, %v194_v34  ;;  %v202_v45 = vrot.slane %v201_v41, 1 }
  0x25   : > { %v203_v46 = vadd.f32 %v202_v45, %v201_v41  ;;  %v208_v47 = vcombine.low %v182_v38, %v189_v43 }
  0x27   : > { %v209_v48 = vcombine.low %v196_v44, %v203_v46  ;;  %v216_v49 = vrot.slane %v208_v47, %v215_v42 }
  0x29   : > { %v223_v50 = vrot.slane %v209_v48, %v215_v42 }
  0x2b   : > { %v224_v51 = vcombine.low %v216_v49, %v223_v50 }
  0x2d   : > { %v231_v53 = vrot.slane %v224_v51, %v215_v42 }
  0x2f   : > { %v233_v54 = vadd.f32 %v231_v53, %v152_v52 }
  0x31   : > { %238 = vst.msk [vmem:[#allocation2] sm:$0xf] %vm409_vm0, %v233_v54 }
  0x38   : > { %v242_v55 = vld [vmem:[#allocation2] sm:$0xf] }
  0x39   : > { %243 = vst.msk [vmem:[%s140_s17] sm:$0xf] %vm409_vm0, %v242_v55 }
  0x3a PF: > { %s11_s8 = sadd.s32 1, %s374_s8   ;;  %s440_s6 = smov %s370_s7 }
  0x3b   : > { %p8_p5 = scmp.ge.s32.totalorder %s11_s8, 6   ;;  %s441_s7 = smov %s443_s9 }
  0x3d   :  { %10 = sbr.rel (!%p8_p5) target bundleno = 2 (0x2), region = 62 }

// kernel: _nsgd_device.3
= control target key start
LH: loop header
LB: loop body
LE: loop exit
PB: predicated region body
PF: predicated region fallthrough
CT: control target
= control target key end

     0   :  { %7 = vsyncpa [#allocation3], 0  ;;  %s413_s9 = smov 0   ;;  %s415_s10 = smov 0   ;;  %s473_s0 = inlined_call_operand.vmem [shape: f32[4], index: 0, kind: input, shape index: {}]   ;;  %s474_s1 = inlined_call_operand.vmem [shape: f32[4,2,512], index: 1, kind: input, shape index: {}]   ;;  %s475_s2 = inlined_call_operand.vmem [shape: f32[4,2,512], index: 2, kind: output, shape index: {}]  }
   0x1   :  { %s417_s11 = smov 0  }
   0x2 LB: > { %s304_s12 = sadd.s32 4294967295, %s395_s11   ;;  %s25_s13 = sadd.s32 1, %s391_s10  ;;  %s395_s11 = sphi %s417_s11, %s13_s11   ;;  %s391_s10 = sphi %s415_s10, %s479_s10   ;;  %s387_s9 = sphi %s413_s9, %s478_s9  }
   0x3   : > { %p27_p0 = scmp.ge.s32.totalorder %s25_s13, 4  ;;  %p306_p1 = scmp.ge.s32.totalorder %s395_s11, 1 }
   0x4   : > { %p107_p2 = scmp.lt.s32.totalorder %s395_s11, 5  ;;  %p438_p4 = scmp.eq.s32.totalorder %s304_s12, 0 }
   0x5   : > { %s481_s13 = smov (%p27_p0, %s25_s13), 0  ;;  %s120_s18 = sshll.u32 %s473_s0, 4  ;;  %s121_s18 = int_to_ptr.vmem [resolvable:$true] %s120_s18 }
   0x6   : > { %p434_p3 = pnand %p306_p1, %p107_p2  ;;  %s354_s19 = scalar_lea.vmem %s121_s18, 16 }
   0x7   : > { %p355_p7 = scmp.ne.s32.totalorder %s121_s18, %s354_s19  ;;  %p362_p11 = scmp.lt.s32.totalorder %s121_s18, %s121_s18 }
   0x8   : > { %p323_p5 = pneg %p434_p3  ;;  %p363_p12 = scmp.lt.s32.totalorder %s354_s19, %s354_s19 }
   0xa   : > { %p324_p6 = pnand %p438_p4, %p323_p5  ;;  %p364_p13 = por %p363_p12, %p362_p11 }
   0xc   : > { %p356_p8 = pneg %p324_p6 }
   0xe   : > { %p357_p9 = pnand %p356_p8, %p355_p7 }
  0x10   : > { %p358_p10 = pneg %p357_p9 }
  0x12   : > { %p365_p0 = pnand %p364_p13, %p358_p10 }
  0x14   : > { %368 = shalt.err (!%p365_p0)
}
  0x15   : > { %s397_s20 = smov [#allocation2]   ;;  %145 = sbr.rel (%p434_p3) target bundleno = 41 (0x29), region = 28 }
  0x16   : > { %326 = dma.vmem_to_smem (!%p324_p6), %s121_s18, 16, %s397_s20, [#allocation3]  }
  0x1c   : > { %382 = dma.done.wait (%p438_p4), [#allocation3], 16  }
  0x1d   : > { %384 = vsyncadd (%p438_p4), [#allocation3], 4294967280 }
  0x1e   : > { %151 = sfence }
  0x1f   : > { %p176_p1 = scmp.lt.s32.totalorder %s387_s9, 3  ;;  %s194_s21 = sld [smem:[#allocation2 + %s387_s9]] }
  0x21   : > { %s483_s9 = smov (!%p176_p1, %s387_s9), 3 }
  0x22   : > { %s317_s22 = sshll.u32 %s483_s9, 3 }
  0x23   : > { %s184_s25 = scalar_lea.vmem %s474_s1, %s317_s22  ;;  %s193_s28 = scalar_lea.vmem %s475_s2, %s317_s22 }
  0x24   : > { %v195_v0 = vld [vmem:[%s184_s25] sm:$0xff] }
  0x25   : > { %v196_v1 = vstv %s194_s21 }
  0x26   : > { %v197_v2 = vmul.f32 %v196_v1, %v195_v0 }
  0x28   : > { %198 = vst [vmem:[%s193_s28] sm:$0xff] %v197_v2 }
  0x29 PF: > { %s13_s11 = sadd.s32 1, %s395_s11   ;;  %s478_s9 = smov %s391_s10 }
  0x2a   : > { %p10_p2 = scmp.ge.s32.totalorder %s13_s11, 6   ;;  %s479_s10 = smov %s481_s13 }
  0x2c   :  { %12 = sbr.rel (!%p10_p2) target bundleno = 2 (0x2), region = 63 }
  0x33   :  { %228 = vsyncpa [#allocation3], 1 }
  0x34   :  { %230 = vsyncpa [#allocation3 + $0x1], 1 }

</bundles_post_ra>
